<compile_context>
chip_gen: v7x
topology: tpu7x:2x2x1
jax: 0.10.0
libtpu: 0.0.40
codegen_flags: <defaults>
</compile_context>

<pallas_src>
import jax
import jax.numpy as jnp
from jax.experimental import pallas as pl
from jax.experimental.pallas import tpu as pltpu


def _round_up(n, m):
    return ((n + m - 1) // m) * m


# ----------------------------------------------------------------------------
# Kernel body
# ----------------------------------------------------------------------------
def _skip_linear_kernel(x_ref, wh_ref, wt_ref, bh_ref, bt_ref, o_ref):
    """One (bm, bn) output tile of the highway layer.

    x_ref : (bm, Fp)   full-K activation tile (also holds the residual slice)
    wh_ref: (Fp, bn)   H weight column tile, (in, out) layout
    wt_ref: (Fp, bn)   T weight column tile
    bh_ref: (1, bn)    H bias tile
    bt_ref: (1, bn)    T bias tile
    o_ref : (bm, bn)
    """
    bn = o_ref.shape[-1]
    j = pl.program_id(0)  # outer (feature / N) tile index

    x = x_ref[...]  # native dtype -> MXU fast path, f32 accumulation below
    h = jnp.dot(x, wh_ref[...], preferred_element_type=jnp.float32)
    z = jnp.dot(x, wt_ref[...], preferred_element_type=jnp.float32)
    h = h + bh_ref[...].astype(jnp.float32)
    z = z + bt_ref[...].astype(jnp.float32)

    # Sigmoid: exp on the EUP; approx reciprocal (also EUP) is well below
    # bf16 quantization noise but kept exact for f32 outputs.
    approx = jnp.dtype(o_ref.dtype).itemsize < 4
    t = pl.reciprocal(1.0 + jnp.exp(-z), approx=approx)

    # Residual slice comes out of the already-resident full-K x tile; bn is a
    # 128-multiple so the lane slice is aligned (no second HBM stream for x).
    x_res = x_ref[:, pl.ds(pl.multiple_of(j * bn, 128), bn)].astype(jnp.float32)

    # Folded blend: t*h + (1-t)*x == x + t*(h - x)
    o_ref[...] = (x_res + t * (h - x_res)).astype(o_ref.dtype)


# ----------------------------------------------------------------------------
# Tile sizing / VMEM budgeting
# ----------------------------------------------------------------------------
def _vmem_budget_bytes():
    cap = 128 * 1024 * 1024
    try:
        info = pltpu.get_tpu_info()
        cap = int(getattr(info, "vmem_capacity_bytes", cap) or cap)
    except Exception:
        pass
    # Leave headroom for compiler scratch / semaphores / spilled intermediates.
    # v7x (64 MiB physical) -> 48 MiB, v5e/v6e (128 MiB) -> 96 MiB.
    return min(cap * 3 // 4, 100 * 1024 * 1024)


def _footprint_bytes(bm, bn, Fp, x_isz, w_isz, o_isz, w_bufs):
    x_bytes = 2 * bm * Fp * x_isz                 # double-buffered activations
    w_bytes = w_bufs * 2 * Fp * bn * w_isz        # H + T weight column tiles
    b_bytes = w_bufs * 2 * 8 * bn * 4             # bias tiles (sublane-padded)
    o_bytes = 2 * bm * bn * o_isz                 # double-buffered output
    scratch = 4 * bm * bn * 4                     # f32 intermediates h/z/t/res
    return x_bytes + w_bytes + b_bytes + o_bytes + scratch


def _pick_bn(Fp, bm, want_bn, budget, x_isz, w_isz, o_isz):
    """Largest 128-multiple divisor of Fp <= want_bn whose tiles fit `budget`.

    Returns (bn, weight_buffer_count).  Prefers bigger bn (fewer x re-reads
    from HBM) over double-buffered weights, per-review.
    """
    cand = max(128, min(_round_up(want_bn, 128), Fp))
    cand = (cand // 128) * 128
    while cand >= 128:
        if Fp % cand == 0:
            for bufs in (2, 1):  # double-buffer weights only if it still fits
                if _footprint_bytes(bm, cand, Fp, x_isz, w_isz, o_isz, bufs) <= budget:
                    return cand, bufs
        cand -= 128
    return 128, 1


# ----------------------------------------------------------------------------
# Parameter prep (one-time; hoist out of the per-call hot path)
# ----------------------------------------------------------------------------
def skip_linear_params(w_h, b_h, w_t, b_t):
    """Prepare weights once.  w_* are (features_in, features_out); b_* are
    (features,) or None.  Pads the feature dim up to a 128-lane multiple so
    every kernel tile stays lane-dense."""
    F = w_h.shape[0]
    Fp = _round_up(max(F, 128), 128)
    if b_h is None:
        b_h = jnp.zeros((F,), w_h.dtype)
    if b_t is None:
        b_t = jnp.zeros((F,), w_t.dtype)
    if Fp != F:
        pad2 = ((0, Fp - F), (0, Fp - F))
        pad1 = ((0, Fp - F),)
        w_h = jnp.pad(w_h, pad2)
        w_t = jnp.pad(w_t, pad2)
        b_h = jnp.pad(b_h, pad1)
        b_t = jnp.pad(b_t, pad1)
    return {
        "w_h": w_h,
        "w_t": w_t,
        "b_h": b_h.reshape(1, Fp),
        "b_t": b_t.reshape(1, Fp),
        "features": F,
    }


# ----------------------------------------------------------------------------
# Core call
# ----------------------------------------------------------------------------
def skip_linear_apply(x, params, *, block_m=256, block_n=1024):
    """Apply the SkipLinear layer with pre-prepared params (see
    skip_linear_params).  x: (..., features)."""
    F = params["features"]
    w_h, w_t, b_h, b_t = params["w_h"], params["w_t"], params["b_h"], params["b_t"]
    Fp = w_h.shape[0]

    orig_shape = x.shape
    assert orig_shape[-1] == F, "feature dim mismatch"
    x2d = x.reshape(-1, F)
    B = x2d.shape[0]

    x_isz = jnp.dtype(x.dtype).itemsize
    w_isz = jnp.dtype(w_h.dtype).itemsize
    o_isz = x_isz
    row_base = {4: 8, 2: 16, 1: 32}.get(x_isz, 8)  # sublane packing

    # --- batch (M) tiling ---------------------------------------------------
    bm = max(row_base, min(block_m, _round_up(B, row_base)))
    bm = _round_up(bm, row_base)
    B_pad = _round_up(B, bm)
    grid_m = B_pad // bm

    # --- feature (N) tiling under the per-generation VMEM budget ------------
    budget = _vmem_budget_bytes()
    bn, w_bufs = _pick_bn(Fp, bm, block_n, budget, x_isz, w_isz, o_isz)
    grid_n = Fp // bn

    # v7x megacore balance: prefer an even extent on the sharded axis.
    if grid_n == 1 and grid_m > 1 and grid_m % 2 == 1 and bm % (2 * row_base) == 0:
        bm //= 2
        B_pad = _round_up(B, bm)
        grid_m = B_pad // bm

    # --- pad activations (rows to bm multiple, features to Fp) --------------
    x_p = x2d
    if Fp != F:
        x_p = jnp.pad(x_p, ((0, 0), (0, Fp - F)))
    if B_pad != B:
        x_p = jnp.pad(x_p, ((0, B_pad - B), (0, 0)))

    # --- grid / specs: m innermost so weight tiles are fetched once per n ---
    grid = (grid_n, grid_m)

    def _wspec(shape):
        if w_bufs == 2:
            return pl.BlockSpec(shape, lambda j, i: (0, j))
        # Weight block index only changes on the outer n axis; single-buffer
        # to halve the dominant VMEM footprint (v7x large-F path).
        return pl.BlockSpec(shape, lambda j, i: (0, j),
                            pipeline_mode=pl.Buffered(1))

    x_spec = pl.BlockSpec((bm, Fp), lambda j, i: (i, 0))
    wh_spec = _wspec((Fp, bn))
    wt_spec = _wspec((Fp, bn))
    bh_spec = _wspec((1, bn))
    bt_spec = _wspec((1, bn))
    o_spec = pl.BlockSpec((bm, bn), lambda j, i: (i, j))

    cost = pl.CostEstimate(
        flops=4 * B_pad * Fp * Fp + 6 * B_pad * Fp,
        transcendentals=B_pad * Fp,
        bytes_accessed=(grid_n + 1) * B_pad * Fp * x_isz
        + 2 * (Fp * Fp + Fp) * w_isz,
    )

    out = pl.pallas_call(
        _skip_linear_kernel,
        out_shape=jax.ShapeDtypeStruct((B_pad, Fp), x.dtype),
        grid_spec=pltpu.PrefetchScalarGridSpec(
            num_scalar_prefetch=0,
            grid=grid,
            in_specs=[x_spec, wh_spec, wt_spec, bh_spec, bt_spec],
            out_specs=o_spec,
        ),
        compiler_params=pltpu.CompilerParams(
            dimension_semantics=("parallel", "parallel"),
            vmem_limit_bytes=budget,
        ),
        cost_estimate=cost,
    )(x_p, w_h, w_t, b_h, b_t)

    if B_pad != B or Fp != F:
        out = out[:B, :F]
    return out.reshape(orig_shape)


def skip_linear(x, w_h, b_h, w_t, b_t, *, block_m=256, block_n=1024):
    """Convenience wrapper.  For repeated calls hoist skip_linear_params()
    out of the hot path (or jit with constant weights so prep folds away)."""
    params = skip_linear_params(w_h, b_h, w_t, b_t)
    return skip_linear_apply(x, params, block_m=block_m, block_n=block_n)


# ----------------------------------------------------------------------------
# Reference
# ----------------------------------------------------------------------------
def skip_linear_ref(x, w_h, b_h, w_t, b_t):
    xf = x.astype(jnp.float32)
    h = xf @ w_h.astype(jnp.float32) + b_h.astype(jnp.float32)
    t = jax.nn.sigmoid(xf @ w_t.astype(jnp.float32) + b_t.astype(jnp.float32))
    return (t * h + (1.0 - t) * xf).astype(x.dtype)


if __name__ == "__main__":
    key = jax.random.PRNGKey(0)
    kx, kwh, kbh, kwt, kbt = jax.random.split(key, 5)

    # --- case 1: f32, single feature tile (grid_n == 1), pre-hoisted params --
    B, F = 16, 128
    bound = 1.0 / (F ** 0.5)
    x = jax.random.normal(kx, (B, F), dtype=jnp.float32)
    w_h = jax.random.uniform(kwh, (F, F), jnp.float32, -bound, bound)
    b_h = jax.random.uniform(kbh, (F,), jnp.float32, -bound, bound)
    w_t = jax.random.uniform(kwt, (F, F), jnp.float32, -bound, bound)
    b_t = jax.random.uniform(kbt, (F,), jnp.float32, -bound, bound)

    params = skip_linear_params(w_h, b_h, w_t, b_t)  # one-time prep
    out = jax.block_until_ready(skip_linear_apply(x, params))
    ref = skip_linear_ref(x, w_h, b_h, w_t, b_t)
    assert out.shape == (B, F)
    assert jnp.allclose(out, ref, atol=1e-5, rtol=1e-5)

    # --- case 2: bf16, feature-tiled (grid_n == 2) -> residual slice at j>0 --
    B2, F2 = 24, 256
    bound2 = 1.0 / (F2 ** 0.5)
    x2 = jax.random.normal(kx, (B2, F2), dtype=jnp.float32)
    w_h2 = jax.random.uniform(kwh, (F2, F2), jnp.float32, -bound2, bound2)
    b_h2 = jax.random.uniform(kbh, (F2,), jnp.float32, -bound2, bound2)
    w_t2 = jax.random.uniform(kwt, (F2, F2), jnp.float32, -bound2, bound2)
    b_t2 = jax.random.uniform(kbt, (F2,), jnp.float32, -bound2, bound2)
    xb, whb, bhb, wtb, btb = (
        a.astype(jnp.bfloat16) for a in (x2, w_h2, b_h2, w_t2, b_t2)
    )
    out2 = jax.block_until_ready(skip_linear(xb, whb, bhb, wtb, btb, block_n=128))
    ref2 = skip_linear_ref(xb, whb, bhb, wtb, btb)
    assert out2.shape == (B2, F2)
    assert jnp.allclose(
        out2.astype(jnp.float32), ref2.astype(jnp.float32), atol=1e-1, rtol=1e-1
    )

    # --- case 3: ragged feature count (F=192 padded to 256), f32, bias=None --
    B3, F3 = 8, 192
    bound3 = 1.0 / (F3 ** 0.5)
    x3 = jax.random.normal(kx, (B3, F3), dtype=jnp.float32)
    w_h3 = jax.random.uniform(kwh, (F3, F3), jnp.float32, -bound3, bound3)
    w_t3 = jax.random.uniform(kwt, (F3, F3), jnp.float32, -bound3, bound3)
    z3 = jnp.zeros((F3,), jnp.float32)
    out3 = jax.block_until_ready(skip_linear(x3, w_h3, None, w_t3, None))
    ref3 = skip_linear_ref(x3, w_h3, z3, w_t3, z3)
    assert out3.shape == (B3, F3)
    assert jnp.allclose(out3, ref3, atol=1e-4, rtol=1e-4)

    print("KERNEL_OK")
</pallas_src>

<mosaic_0001>
module attributes {stable_mosaic.version = 11 : i64} {
  func.func @_skip_linear_kernel(%arg0: i32, %arg1: i32, %arg2: memref<16x128xf32, #tpu.memory_space<vmem>>, %arg3: memref<128x128xf32, #tpu.memory_space<vmem>>, %arg4: memref<128x128xf32, #tpu.memory_space<vmem>>, %arg5: memref<1x128xf32, #tpu.memory_space<vmem>>, %arg6: memref<1x128xf32, #tpu.memory_space<vmem>>, %arg7: memref<16x128xf32, #tpu.memory_space<vmem>>) attributes {dimension_semantics = [#tpu.dimension_semantics<parallel>, #tpu.dimension_semantics<parallel>], iteration_bounds = array<i64: 1, 1>, scalar_prefetch = 0 : i64, scratch_operands = 0 : i64, tpu.core_type = #tpu.core_type<tc>, window_params = [{transform_indices = @transform_0, window_bounds = array<i64: 16, 128>}, {transform_indices = @transform_1, window_bounds = array<i64: 128, 128>}, {transform_indices = @transform_2, window_bounds = array<i64: 128, 128>}, {transform_indices = @transform_3, window_bounds = array<i64: 1, 128>}, {transform_indices = @transform_4, window_bounds = array<i64: 1, 128>}, {transform_indices = @transform_5, window_bounds = array<i64: 16, 128>}]} {
    %c0 = arith.constant 0 : index
    %c0_0 = arith.constant 0 : index
    %0 = vector.load %arg2[%c0, %c0_0] : memref<16x128xf32, #tpu.memory_space<vmem>>, vector<16x128xf32>
    %c0_1 = arith.constant 0 : index
    %c0_2 = arith.constant 0 : index
    %1 = vector.load %arg3[%c0_1, %c0_2] : memref<128x128xf32, #tpu.memory_space<vmem>>, vector<128x128xf32>
    %cst = arith.constant dense<0.000000e+00> : vector<16x128xf32>
    %2 = tpu.matmul %0, %1, %cst {dimension_numbers = #tpu.dot_dimension_numbers<[1], [0], [0], [1], [0, 0, 1, 1], [], []>} : vector<16x128xf32>, vector<128x128xf32>, vector<16x128xf32> -> vector<16x128xf32>
    %c0_3 = arith.constant 0 : index
    %c0_4 = arith.constant 0 : index
    %3 = vector.load %arg4[%c0_3, %c0_4] : memref<128x128xf32, #tpu.memory_space<vmem>>, vector<128x128xf32>
    %cst_5 = arith.constant dense<0.000000e+00> : vector<16x128xf32>
    %4 = tpu.matmul %0, %3, %cst_5 {dimension_numbers = #tpu.dot_dimension_numbers<[1], [0], [0], [1], [0, 0, 1, 1], [], []>} : vector<16x128xf32>, vector<128x128xf32>, vector<16x128xf32> -> vector<16x128xf32>
    %c0_6 = arith.constant 0 : index
    %c0_7 = arith.constant 0 : index
    %5 = vector.load %arg5[%c0_6, %c0_7] : memref<1x128xf32, #tpu.memory_space<vmem>>, vector<1x128xf32>
    %6 = vector.broadcast %5 : vector<1x128xf32> to vector<16x128xf32>
    %7 = arith.addf %2, %6 : vector<16x128xf32>
    %c0_8 = arith.constant 0 : index
    %c0_9 = arith.constant 0 : index
    %8 = vector.load %arg6[%c0_8, %c0_9] : memref<1x128xf32, #tpu.memory_space<vmem>>, vector<1x128xf32>
    %9 = vector.broadcast %8 : vector<1x128xf32> to vector<16x128xf32>
    %10 = arith.addf %4, %9 : vector<16x128xf32>
    %cst_10 = arith.constant 0.000000e+00 : f32
    %11 = vector.broadcast %cst_10 : f32 to vector<16x128xf32>
    %12 = arith.subf %11, %10 : vector<16x128xf32>
    %13 = math.exp %12 : vector<16x128xf32>
    %cst_11 = arith.constant 1.000000e+00 : f32
    %14 = vector.broadcast %cst_11 : f32 to vector<16x128xf32>
    %15 = arith.addf %14, %13 : vector<16x128xf32>
    %16 = tpu.reciprocal %15 : vector<16x128xf32> -> vector<16x128xf32>
    %c128_i32 = arith.constant 128 : i32
    %17 = arith.muli %arg0, %c128_i32 : i32
    %18 = tpu.assume_multiple %17, 128 : i32
    %c0_12 = arith.constant 0 : index
    %19 = arith.index_cast %18 : i32 to index
    %20 = vector.load %arg2[%c0_12, %19] : memref<16x128xf32, #tpu.memory_space<vmem>>, vector<16x128xf32>
    %21 = arith.subf %7, %20 : vector<16x128xf32>
    %22 = arith.mulf %16, %21 : vector<16x128xf32>
    %23 = arith.addf %20, %22 : vector<16x128xf32>
    %c0_13 = arith.constant 0 : index
    %c0_14 = arith.constant 0 : index
    %24 = vector.load %arg7[%c0_13, %c0_14] : memref<16x128xf32, #tpu.memory_space<vmem>>, vector<16x128xf32>
    tpu.vector_store %arg7[%c0_13, %c0_14], %23 {strides = array<i32>} : memref<16x128xf32, #tpu.memory_space<vmem>>, vector<16x128xf32>,
    return
  }
  func.func @transform_0(%arg0: i32, %arg1: i32) -> (i32, i32) {
    %c0_i32 = arith.constant 0 : i32
    %c0_i32_0 = arith.constant 0 : i32
    return %arg1, %c0_i32 : i32, i32
  }
  func.func @transform_1(%arg0: i32, %arg1: i32) -> (i32, i32) {
    %c0_i32 = arith.constant 0 : i32
    %c0_i32_0 = arith.constant 0 : i32
    return %c0_i32, %arg0 : i32, i32
  }
  func.func @transform_2(%arg0: i32, %arg1: i32) -> (i32, i32) {
    %c0_i32 = arith.constant 0 : i32
    %c0_i32_0 = arith.constant 0 : i32
    return %c0_i32, %arg0 : i32, i32
  }
  func.func @transform_3(%arg0: i32, %arg1: i32) -> (i32, i32) {
    %c0_i32 = arith.constant 0 : i32
    %c0_i32_0 = arith.constant 0 : i32
    return %c0_i32, %arg0 : i32, i32
  }
  func.func @transform_4(%arg0: i32, %arg1: i32) -> (i32, i32) {
    %c0_i32 = arith.constant 0 : i32
    %c0_i32_0 = arith.constant 0 : i32
    return %c0_i32, %arg0 : i32, i32
  }
  func.func @transform_5(%arg0: i32, %arg1: i32) -> (i32, i32) {
    %c0_i32 = arith.constant 0 : i32
    return %arg1, %arg0 : i32, i32
  }
}

</mosaic_0001>

<bundles_post_ra>
// kernel: tpu_custom_call.1
= control target key start
LH: loop header
LB: loop body
LE: loop exit
PB: predicated region body
PF: predicated region fallthrough
CT: control target
= control target key end

     0   :  { %10 = vsyncpa [#allocation3], 0  ;;  %s798_s0 = inlined_call_operand.hbm [shape: f32[16,128], index: 0, kind: input, shape index: {}]   ;;  %s799_s1 = inlined_call_operand.hbm [shape: f32[128,128], index: 1, kind: input, shape index: {}]   ;;  %s800_s2 = inlined_call_operand.hbm [shape: f32[128,128], index: 2, kind: input, shape index: {}]   ;;  %s801_s3 = inlined_call_operand.hbm [shape: f32[1,128], index: 3, kind: input, shape index: {}]   ;;  %s802_s4 = inlined_call_operand.hbm [shape: f32[1,128], index: 4, kind: input, shape index: {}]   ;;  %s803_s5 = inlined_call_operand.hbm [shape: f32[16,128], index: 5, kind: output, shape index: {}]  }
   0x1   :  { %11 = vsyncpa [#allocation6], 0 }
   0x2   :  { %12 = vsyncpa [#allocation9], 0 }
   0x3   :  { %13 = vsyncpa [#allocation4], 0  ;;  %s655_s18 = smov [#allocation5]   ;;  %s656_s20 = smov [#allocation8]  }
   0x4   :  { %s31_s19 = sshll.u32 %s655_s18, 4  ;;  %s56_s21 = sshll.u32 %s656_s20, 4  ;;  %s32_s19 = int_to_ptr.vmem [resolvable:$true] %s31_s19  ;;  %s693_s21 = int_to_ptr.vmem [resolvable:$true] %s56_s21 }
   0x5   :  { %s515_s24 = scalar_lea.hbm %s799_s1, 2048 }
   0x6   :  { %p516_p0 = scmp.ne.s32.totalorder %s799_s1, %s515_s24  ;;  %p519_p1 = scmp.lt.u32.totalorder %s515_s24, %s799_s1 }
   0x8   :  { %p521_p2 = pnand %p519_p1, %p516_p0 }
   0xa   :  { %524 = shalt.err (!%p521_p2)
}
   0xb   :  { %s525_s29 = scalar_lea.vmem %s32_s19, 2048  ;;  %p530_p4 = scmp.lt.s32.totalorder %s32_s19, %s32_s19 }
   0xc   :  { %p526_p3 = scmp.ne.s32.totalorder %s32_s19, %s525_s29  ;;  %p531_p5 = scmp.lt.s32.totalorder %s525_s29, %s525_s29 }
   0xe   :  { %p532_p6 = por %p531_p5, %p530_p4 }
  0x10   :  { %p533_p7 = pnand %p532_p6, %p526_p3 }
  0x12   :  { %536 = shalt.err (!%p533_p7)
}
  0x13   :  { %s657_s30 = smov 128   ;;  %s658_s6 = smov 8  }
  0x14   :  { %37 = dma.hbm_to_vmem [thread:$0]  %s799_s1, 2048, %s32_s19, [#allocation6], %s657_s30, %s657_s30, %s658_s6  }
  0x15   :  { %s537_s11 = scalar_lea.hbm %s801_s3, 16 }
  0x16   :  { %p538_p8 = scmp.ne.s32.totalorder %s801_s3, %s537_s11  ;;  %p541_p9 = scmp.lt.u32.totalorder %s537_s11, %s801_s3 }
  0x18   :  { %p543_p10 = pnand %p541_p9, %p538_p8 }
  0x1a   :  { %546 = shalt.err (!%p543_p10)
}
  0x1b   :  { %s547_s16 = scalar_lea.vmem %s693_s21, 16  ;;  %s551_s1 = scalar_lea.vmem %s693_s21, 32 }
  0x1c   :  { %p548_p11 = scmp.ne.s32.totalorder %s693_s21, %s547_s16  ;;  %p552_p12 = scmp.lt.s32.totalorder %s693_s21, %s693_s21 }
  0x1d   :  { %p553_p13 = scmp.lt.s32.totalorder %s551_s1, %s547_s16 }
  0x1f   :  { %p554_p0 = por %p553_p13, %p552_p12 }
  0x21   :  { %p555_p1 = pnand %p554_p0, %p548_p11 }
  0x23   :  { %558 = shalt.err (!%p555_p1)
}
  0x24   :  { %59 = dma.hbm_to_vmem [thread:$0]  %s801_s3, 16, %s693_s21, [#allocation9]  }
  0x25   :  { %s659_s19 = smov [#allocation2]   ;;  %s660_s22 = smov [#allocation7]  }
  0x26   :  { %s19_s20 = sshll.u32 %s659_s19, 4  ;;  %s43_s23 = sshll.u32 %s660_s22, 4  ;;  %s20_s20 = int_to_ptr.vmem [resolvable:$true] %s19_s20  ;;  %s728_s23 = int_to_ptr.vmem [resolvable:$true] %s43_s23 }
  0x27   :  { %s559_s26 = scalar_lea.hbm %s798_s0, 256 }
  0x28   :  { %p560_p2 = scmp.ne.s32.totalorder %s798_s0, %s559_s26  ;;  %p563_p3 = scmp.lt.u32.totalorder %s559_s26, %s798_s0 }
  0x2a   :  { %p565_p4 = pnand %p563_p3, %p560_p2 }
  0x2c   :  { %568 = shalt.err (!%p565_p4)
}
  0x2d   :  { %s569_s3 = scalar_lea.vmem %s20_s20, 256  ;;  %p574_p6 = scmp.lt.s32.totalorder %s20_s20, %s20_s20 }
  0x2e   :  { %p570_p5 = scmp.ne.s32.totalorder %s20_s20, %s569_s3  ;;  %p575_p7 = scmp.lt.s32.totalorder %s569_s3, %s569_s3 }
  0x30   :  { %p576_p8 = por %p575_p7, %p574_p6 }
  0x32   :  { %p577_p9 = pnand %p576_p8, %p570_p5 }
  0x34   :  { %580 = shalt.err (!%p577_p9)
}
  0x35   :  { %25 = dma.hbm_to_vmem [thread:$0]  %s798_s0, 256, %s20_s20, [#allocation3], %s657_s30, %s657_s30, %s658_s6  }
  0x36   :  { %s581_s11 = scalar_lea.hbm %s800_s2, 2048 }
  0x37   :  { %p582_p10 = scmp.ne.s32.totalorder %s800_s2, %s581_s11  ;;  %p585_p11 = scmp.lt.u32.totalorder %s581_s11, %s800_s2 }
  0x39   :  { %p587_p12 = pnand %p585_p11, %p582_p10 }
  0x3b   :  { %590 = shalt.err (!%p587_p12)
}
  0x3c   :  { %s591_s16 = scalar_lea.vmem %s728_s23, 2048  ;;  %p596_p0 = scmp.lt.s32.totalorder %s728_s23, %s728_s23 }
  0x3d   :  { %p592_p13 = scmp.ne.s32.totalorder %s728_s23, %s591_s16  ;;  %p597_p1 = scmp.lt.s32.totalorder %s591_s16, %s591_s16 }
  0x3f   :  { %p598_p2 = por %p597_p1, %p596_p0 }
  0x41   :  { %p599_p3 = pnand %p598_p2, %p592_p13 }
  0x43   :  { %602 = shalt.err (!%p599_p3)
}
  0x44   :  { %49 = dma.hbm_to_vmem [thread:$0]  %s800_s2, 2048, %s728_s23, [#allocation6], %s657_s30, %s657_s30, %s658_s6  }
  0x45   :  { %s661_s17 = smov [#allocation10]   ;;  %s603_s22 = scalar_lea.hbm %s802_s4, 16 }
  0x46   :  { %s66_s18 = sshll.u32 %s661_s17, 4  ;;  %p604_p4 = scmp.ne.s32.totalorder %s802_s4, %s603_s22  ;;  %s67_s18 = int_to_ptr.vmem [resolvable:$true] %s66_s18 }
  0x47   :  { %p607_p5 = scmp.lt.u32.totalorder %s603_s22, %s802_s4 }
  0x49   :  { %p609_p6 = pnand %p607_p5, %p604_p4 }
  0x4b   :  { %612 = shalt.err (!%p609_p6)
}
  0x4c   :  { %s613_s28 = scalar_lea.vmem %s67_s18, 16  ;;  %s617_s2 = scalar_lea.vmem %s67_s18, 32 }
  0x4d   :  { %p614_p7 = scmp.ne.s32.totalorder %s67_s18, %s613_s28  ;;  %p618_p8 = scmp.lt.s32.totalorder %s67_s18, %s67_s18 }
  0x4e   :  { %p619_p9 = scmp.lt.s32.totalorder %s617_s2, %s613_s28 }
  0x50   :  { %p620_p10 = por %p619_p9, %p618_p8 }
  0x52   :  { %p621_p11 = pnand %p620_p10, %p614_p7 }
  0x54   :  { %624 = shalt.err (!%p621_p11)
}
  0x55   :  { %69 = dma.hbm_to_vmem [thread:$0]  %s802_s4, 16, %s67_s18, [#allocation9]  }
  0x56   :  { %647 = dma.done.wait [#allocation3], 256  }
  0x57   :  { %648 = vsyncadd [#allocation3], 4294967040 }
  0x58   :  { %649 = dma.done.wait [#allocation6], 4096  }
  0x59   :  { %650 = vsyncadd [#allocation6], 4294963200 }
  0x5a   :  { %651 = dma.done.wait [#allocation9], 32  }
  0x5b   :  { %652 = vsyncadd [#allocation9], 4294967264  ;;  %v103_v0 = vld [vmem:[#allocation7] sm:$0xff]  ;;  %v104_v1 = vld [vmem:[#allocation7 + $0x8] sm:$0xff]  ;;  %s662_s4 = smov [#allocation11]  }
  0x5c   :  { %v105_v2 = vld [vmem:[#allocation7 + $0x10] sm:$0xff]  ;;  %v467_v3 = vpack.c.bf16 %v104_v1, %v103_v0  ;;  %v106_v4 = vld [vmem:[#allocation7 + $0x18] sm:$0xff]  ;;  %v107_v6 = vld [vmem:[#allocation7 + $0x20] sm:$0xff]  ;;  %s312_s7 = sshll.u32 %s662_s4, 4  ;;  %s313_s7 = int_to_ptr.vmem [resolvable:$true] %s312_s7 }
  0x5d   :  { %v471_v5 = vpack.c.bf16 %v106_v4, %v105_v2  ;;  %v108_v7 = vld [vmem:[#allocation7 + $0x28] sm:$0xff]  ;;  %v87_v8 = vld [vmem:[#allocation5] sm:$0xff]  ;;  %v109_v10 = vld [vmem:[#allocation7 + $0x30] sm:$0xff]  ;;  %s625_s3 = scalar_lea.vmem %s313_s7, 256  ;;  %p630_p13 = scmp.lt.s32.totalorder %s313_s7, %s313_s7 }
  0x5e   :  { %468 = vmatprep.subr.bf16.mxu1 %v467_v3  ;;  %v475_v9 = vpack.c.bf16 %v108_v7, %v107_v6  ;;  %v110_v11 = vld [vmem:[#allocation7 + $0x38] sm:$0xff]  ;;  %v88_v12 = vld [vmem:[#allocation5 + $0x8] sm:$0xff]  ;;  %v89_v14 = vld [vmem:[#allocation5 + $0x10] sm:$0xff]  ;;  %p626_p12 = scmp.ne.s32.totalorder %s313_s7, %s625_s3  ;;  %p631_p0 = scmp.lt.s32.totalorder %s625_s3, %s625_s3 }
  0x5f   :  { %470 = vmatpush3.bf16.msra.mxu1 %v467_v3  ;;  %v435_v13 = vpack.c.bf16 %v88_v12, %v87_v8  ;;  %v90_v15 = vld [vmem:[#allocation5 + $0x18] sm:$0xff]  ;;  %v777_v16 = vld [vmem:[#allocation2] sm:$0xff]  ;;  %v91_v18 = vld [vmem:[#allocation5 + $0x20] sm:$0xff]  ;;  %v479_v20 = vpack.c.bf16 %v110_v11, %v109_v10 }
  0x60   :  { %472 = vmatprep.subr.bf16.mxu1 %v471_v5  ;;  %v439_v17 = vpack.c.bf16 %v90_v15, %v89_v14  ;;  %432 = vmatprep.mubr.f32.mxu1 %v777_v16  ;;  %v92_v19 = vld [vmem:[#allocation5 + $0x28] sm:$0xff]  ;;  %v111_v21 = vld [vmem:[#allocation7 + $0x40] sm:$0xff]  ;;  %v93_v24 = vld [vmem:[#allocation5 + $0x30] sm:$0xff]  ;;  %p632_p1 = por %p631_p0, %p630_p13 }
  0x61   :  { %397 = vmatprep.mubr.f32.mxu0 %v777_v16  ;;  %436 = vmatprep.subr.bf16.mxu0 %v435_v13  ;;  %v112_v22 = vld [vmem:[#allocation7 + $0x48] sm:$0xff]  ;;  %v443_v23 = vpack.c.bf16 %v92_v19, %v91_v18  ;;  %v94_v25 = vld [vmem:[#allocation5 + $0x38] sm:$0xff]  ;;  %v113_v27 = vld [vmem:[#allocation7 + $0x50] sm:$0xff] }
  0x62   :  { %438 = vmatpush3.bf16.msra.mxu0 %v435_v13  ;;  %v483_v26 = vpack.c.bf16 %v112_v22, %v111_v21  ;;  %v114_v28 = vld [vmem:[#allocation7 + $0x58] sm:$0xff]  ;;  %v447_v29 = vpack.c.bf16 %v94_v25, %v93_v24  ;;  %v95_v30 = vld [vmem:[#allocation5 + $0x40] sm:$0xff]  ;;  %v96_v31 = vld [vmem:[#allocation5 + $0x48] sm:$0xff]  ;;  %p633_p2 = pnand %p632_p1, %p626_p12 }
  0x63   :  { %474 = vmatpush3.bf16.msra.mxu1 %v471_v5  ;;  %440 = vmatprep.subr.bf16.mxu0 %v439_v17  ;;  %v487_v32 = vpack.c.bf16 %v114_v28, %v113_v27  ;;  %v115_v33 = vld [vmem:[#allocation7 + $0x60] sm:$0xff]  ;;  %v116_v34 = vld [vmem:[#allocation7 + $0x68] sm:$0xff]  ;;  %v451_v35 = vpack.c.bf16 %v96_v31, %v95_v30  ;;  %v97_v36 = vld [vmem:[#allocation5 + $0x50] sm:$0xff] }
  0x64   :  { %476 = vmatprep.subr.bf16.mxu1 %v475_v9  ;;  %v98_v37 = vld [vmem:[#allocation5 + $0x58] sm:$0xff]  ;;  %v491_v38 = vpack.c.bf16 %v116_v34, %v115_v33  ;;  %v117_v39 = vld [vmem:[#allocation7 + $0x70] sm:$0xff]  ;;  %v99_v42 = vld [vmem:[#allocation5 + $0x60] sm:$0xff] }
  0x65   :  { %v118_v40 = vld [vmem:[#allocation7 + $0x78] sm:$0xff]  ;;  %v455_v41 = vpack.c.bf16 %v98_v37, %v97_v36  ;;  %v100_v43 = vld [vmem:[#allocation5 + $0x68] sm:$0xff]  ;;  %v101_v46 = vld [vmem:[#allocation5 + $0x70] sm:$0xff] }
  0x66   :  { %442 = vmatpush3.bf16.msra.mxu0 %v439_v17  ;;  %v495_v44 = vpack.c.bf16 %v118_v40, %v117_v39  ;;  %v459_v45 = vpack.c.bf16 %v100_v43, %v99_v42  ;;  %v102_v47 = vld [vmem:[#allocation5 + $0x78] sm:$0xff]  ;;  %v328_v50 = vld [vmem:[#allocation10] ss:$0 sm:$0xff]  ;;  %v327_v1 = vld [vmem:[#allocation8] ss:$0 sm:$0xff] }
  0x67   :  { %478 = vmatpush3.bf16.msra.mxu1 %v475_v9  ;;  %444 = vmatprep.subr.bf16.mxu0 %v443_v23  ;;  %v463_v48 = vpack.c.bf16 %v102_v47, %v101_v46  ;;  %v86_v49 = vld [vmem:[#allocation2 + $0x8] sm:$0xff] }
  0x68   :  { %480 = vmatprep.subr.bf16.mxu1 %v479_v20 }
  0x6a   :  { %446 = vmatpush3.bf16.msra.mxu0 %v443_v23 }
  0x6b   :  { %482 = vmatpush3.bf16.msra.mxu1 %v479_v20  ;;  %448 = vmatprep.subr.bf16.mxu0 %v447_v29 }
  0x6c   :  { %484 = vmatprep.subr.bf16.mxu1 %v483_v26 }
  0x6e   :  { %450 = vmatpush3.bf16.msra.mxu0 %v447_v29 }
  0x6f   :  { %486 = vmatpush3.bf16.msra.mxu1 %v483_v26  ;;  %452 = vmatprep.subr.bf16.mxu0 %v451_v35 }
  0x70   :  { %488 = vmatprep.subr.bf16.mxu1 %v487_v32 }
  0x72   :  { %454 = vmatpush3.bf16.msra.mxu0 %v451_v35 }
  0x73   :  { %490 = vmatpush3.bf16.msra.mxu1 %v487_v32  ;;  %456 = vmatprep.subr.bf16.mxu0 %v455_v41 }
  0x74   :  { %492 = vmatprep.subr.bf16.mxu1 %v491_v38 }
  0x76   :  { %458 = vmatpush3.bf16.msra.mxu0 %v455_v41 }
  0x77   :  { %494 = vmatpush3.bf16.msra.mxu1 %v491_v38  ;;  %460 = vmatprep.subr.bf16.mxu0 %v459_v45 }
  0x78   :  { %496 = vmatprep.subr.bf16.mxu1 %v495_v44 }
  0x7a   :  { %462 = vmatpush3.bf16.msra.mxu0 %v459_v45 }
  0x7b   :  { %498 = vmatpush3.bf16.msra.mxu1 %v495_v44  ;;  %464 = vmatprep.subr.bf16.mxu0 %v463_v48 }
  0x7e   :  { %433 = vmatmul.mubr.f32.vlgmr.msra.gmra.mrb[0].mxu1 %v86_v49  ;;  %466 = vmatpush3.bf16.msra.mxu0 %v463_v48 }
  0x81   :  { %398 = vmatmul.mubr.f32.vlgmr.msra.gmra.mrb[0].mxu0 %v86_v49 }
 0x151   :  { %v434_v51 = vpop.f32.mrb[0].mxu1 }
 0x152   :  { %v280_v52 = vadd.f32 %v434_v51, %v328_v50  ;;  %v274_v53 = vpop.f32.mrb[1].mxu1 }
 0x153   :  { %v275_v54 = vadd.f32 %v328_v50, %v274_v53 }
 0x154   :  { %v284_v55 = vsub.f32 0.0, %v280_v52  ;;  %v399_v58 = vpop.f32.mrb[0].mxu0 }
 0x155   :  { %v283_v56 = vsub.f32 0.0, %v275_v54  ;;  %v192_v60 = vpop.f32.mrb[1].mxu0  ;;  %v198_v2 = vadd.f32 %v399_v58, %v327_v1 }
 0x156   :  { %v287_v57 = vmul.f32 1.442695, %v284_v55  ;;  %v193_v3 = vadd.f32 %v327_v1, %v192_v60 }
 0x157   :  { %v285_v59 = vmul.f32 1.442695, %v283_v56  ;;  %v300_v4 = vsub.f32 %v198_v2, %v86_v49 }
 0x158   :  { %507 = vpow2.f32 %v287_v57  ;;  %v299_v5 = vsub.f32 %v193_v3, %v777_v16 }
 0x159   :  { %509 = vpow2.f32 %v285_v59 }
 0x162   :  { %v508_v61 = vpop.eup %507 }
 0x163   :  { %v510_v62 = vpop.eup %509  ;;  %v290_v63 = vadd.f32 1.0, %v508_v61 }
 0x164   :  { %v289_v0 = vadd.f32 1.0, %v510_v62 }
 0x165   :  { %511 = vrcp.f32 %v290_v63 }
 0x166   :  { %513 = vrcp.f32 %v289_v0 }
 0x16f   :  { %v512_v6 = vpop.eup %511 }
 0x170   :  { %v514_v7 = vpop.eup %513  ;;  %v302_v8 = vmul.f32 %v512_v6, %v300_v4 }
 0x171   :  { %v301_v9 = vmul.f32 %v514_v7, %v299_v5 }
 0x172   :  { %v304_v10 = vadd.f32 %v302_v8, %v86_v49 }
 0x173   :  { %v303_v11 = vadd.f32 %v301_v9, %v777_v16 }
 0x174   :  { %306 = vst [vmem:[#allocation11 + $0x8] sm:$0xff] %v304_v10 }
 0x175   :  { %305 = vst [vmem:[#allocation11] sm:$0xff] %v303_v11 }
 0x176   :  { %636 = shalt.err (!%p633_p2)
}
 0x177   :  { %s637_s9 = scalar_lea.hbm %s803_s5, 256 }
 0x178   :  { %p638_p3 = scmp.ne.s32.totalorder %s803_s5, %s637_s9  ;;  %p641_p4 = scmp.lt.u32.totalorder %s637_s9, %s803_s5 }
 0x17a   :  { %p643_p5 = pnand %p641_p4, %p638_p3 }
 0x17c   :  { %646 = shalt.err (!%p643_p5)
}
 0x17d   :  { %318 = dma.vmem_to_hbm [thread:$0]  %s313_s7, 256, %s803_s5, [#allocation4], %s657_s30, %s657_s30, %s658_s6  }
 0x17e   :  { %653 = dma.done.wait [#allocation4], 256  }
 0x17f   :  { %654 = vsyncadd [#allocation4], 4294967040 }
 0x180   :  { %322 = vsyncpa [#allocation3], 1 }
 0x181   :  { %323 = vsyncpa [#allocation6], 1 }
 0x182   :  { %324 = vsyncpa [#allocation9], 1 }
 0x183   :  { %325 = vsyncpa [#allocation4], 1 }

</bundles_post_ra>
